<compile_context>
chip_gen: v7x
topology: tpu7x:2x2x1
jax: 0.10.0
libtpu: 0.0.40
codegen_flags: <defaults>
</compile_context>

<pallas_src>
import functools

import jax
import jax.numpy as jnp
from jax.experimental import pallas as pl
from jax.experimental.pallas import tpu as pltpu

EPS = 1e-6


def _round_up(x, m):
    return ((x + m - 1) // m) * m


def add_and_norm_kernel(alpha_ref, beta_ref, x_ref, w_ref, b_ref, o_ref, *,
                        matmul_dtype):
    # x_ref : (TM, D) tile of the flattened input (rows = tokens)
    # w_ref : (D, D) sublayer Linear weight (stored for y @ W), matmul_dtype
    # b_ref : (1, D) sublayer Linear bias (f32)
    # alpha_ref / beta_ref : scalar LayerNorm params in SMEM
    x = x_ref[...].astype(jnp.float32)
    d = x.shape[-1]

    # ---- LayerNormalization (torch semantics: unbiased std, /(std+eps)) ----
    mean = jnp.mean(x, axis=-1, keepdims=True)
    centered = x - mean
    var_unbiased = jnp.sum(centered * centered, axis=-1, keepdims=True) / (d - 1)
    std = jnp.sqrt(var_unbiased)
    # reciprocal goes to the EUP slot instead of a VALU divide.
    inv = pl.reciprocal(std + EPS, approx=True)
    y = alpha_ref[0] * (centered * inv) + beta_ref[0]

    # ---- sublayer: Linear(d_model, d_model) on the MXU ----
    # bf16 operands for MXU peak rate; accumulation stays in f32.
    z = jnp.dot(y.astype(matmul_dtype), w_ref[...],
                preferred_element_type=jnp.float32)
    z = z + b_ref[...].astype(jnp.float32)

    # ---- dropout (inference => identity) + residual add ----
    # Re-read x from the (still resident) VMEM tile instead of keeping the f32
    # copy live across the matmul -> smaller live vreg footprint at large TM.
    o_ref[...] = (x_ref[...].astype(jnp.float32) + z).astype(o_ref.dtype)


def add_and_norm(x, w, b, alpha, beta, *, block_rows=256,
                 matmul_dtype=jnp.bfloat16):
    """x: (B, S, D); w: (D, D); b: (1, D); alpha, beta: (1,) scalars."""
    B, S, D = x.shape
    M = B * S
    x2 = x.reshape(M, D)

    # Fixed row tile (multiple of 8 sublanes); pad rows so the grid covers M.
    tm = min(block_rows, _round_up(M, 8))
    Mp = _round_up(M, tm)
    if Mp != M:
        x2 = jnp.pad(x2, ((0, Mp - M), (0, 0)))
    grid = (Mp // tm,)

    w_mm = w.astype(matmul_dtype)
    b2 = b.reshape(1, D).astype(jnp.float32)

    # Explicit VMEM budget: 2x input tile + 2x output tile + 2x weight buffer
    # (constant index_map still gets a second pipeline buffer) + bias + slack.
    x_bytes = jnp.dtype(x.dtype).itemsize
    w_bytes = jnp.dtype(matmul_dtype).itemsize
    vmem_bytes = (2 * tm * D * x_bytes        # double-buffered input tile
                  + 2 * tm * D * x_bytes      # double-buffered output tile
                  + 2 * D * D * w_bytes       # weight (2 pipeline buffers)
                  + 2 * D * 4                 # bias
                  + (4 << 20))                # headroom
    vmem_limit = int(min(max(vmem_bytes, 8 << 20), 96 << 20))

    kernel = functools.partial(add_and_norm_kernel, matmul_dtype=matmul_dtype)

    out = pl.pallas_call(
        kernel,
        out_shape=jax.ShapeDtypeStruct((Mp, D), x.dtype),
        grid=grid,
        in_specs=[
            pl.BlockSpec(memory_space=pltpu.SMEM),       # alpha (scalar)
            pl.BlockSpec(memory_space=pltpu.SMEM),       # beta  (scalar)
            pl.BlockSpec((tm, D), lambda i: (i, 0)),     # x row tile
            pl.BlockSpec((D, D), lambda i: (0, 0)),      # sublayer weight
            pl.BlockSpec((1, D), lambda i: (0, 0)),      # sublayer bias
        ],
        out_specs=pl.BlockSpec((tm, D), lambda i: (i, 0)),
        compiler_params=pltpu.CompilerParams(
            dimension_semantics=("parallel",),           # rows independent; 2 TCs on v7x
            vmem_limit_bytes=vmem_limit),
    )(alpha, beta, x2, w_mm, b2)

    return out[:M].reshape(B, S, D)


def reference(x, w, b, alpha, beta):
    mean = jnp.mean(x, axis=-1, keepdims=True)
    std = jnp.std(x, axis=-1, keepdims=True, ddof=1)   # unbiased, like torch
    y = alpha[0] * ((x - mean) / (std + EPS)) + beta[0]
    z = jnp.einsum("bsd,de->bse", y, w) + b[0]
    return x + z


if __name__ == "__main__":
    B, S, D = 2, 8, 32
    key = jax.random.PRNGKey(0)
    kx, kw, kb = jax.random.split(key, 3)

    x = jax.random.normal(kx, (B, S, D), dtype=jnp.float32)
    # Deterministic sublayer (Linear d_model -> d_model) parameters.
    w = jax.random.normal(kw, (D, D), dtype=jnp.float32) * 0.02
    b = jax.random.normal(kb, (1, D), dtype=jnp.float32) * 0.02
    # LayerNormalization parameters (match nn.Parameter init: ones / zeros).
    alpha = jnp.ones((1,), dtype=jnp.float32)
    beta = jnp.zeros((1,), dtype=jnp.float32)

    out = add_and_norm(x, w, b, alpha, beta)
    out = jax.block_until_ready(out)

    ref = reference(x, w, b, alpha, beta)
    assert out.shape == (B, S, D)
    # bf16 MXU operands + approx reciprocal => slightly looser tolerance than f32.
    assert jnp.allclose(out, ref, atol=1e-2, rtol=1e-2), "mismatch vs reference"

    print("KERNEL_OK")
</pallas_src>

<mosaic_0001>
module attributes {stable_mosaic.version = 11 : i64} {
  func.func @add_and_norm_kernel(%arg0: i32, %arg1: memref<1xf32, #tpu.memory_space<smem>>, %arg2: memref<1xf32, #tpu.memory_space<smem>>, %arg3: memref<16x32xf32, #tpu.memory_space<vmem>>, %arg4: memref<32x32xbf16, #tpu.memory_space<vmem>>, %arg5: memref<1x32xf32, #tpu.memory_space<vmem>>, %arg6: memref<16x32xf32, #tpu.memory_space<vmem>>) attributes {dimension_semantics = [#tpu.dimension_semantics<parallel>], iteration_bounds = array<i64: 1>, scalar_prefetch = 0 : i64, scratch_operands = 0 : i64, tpu.core_type = #tpu.core_type<tc>, window_params = [{transform_indices = @transform_0, window_bounds = array<i64: 1>}, {transform_indices = @transform_1, window_bounds = array<i64: 1>}, {transform_indices = @transform_2, window_bounds = array<i64: 16, 32>}, {pipeline_mode = #tpu.pipeline_mode<synchronous>, transform_indices = @transform_3, window_bounds = array<i64: 32, 32>}, {pipeline_mode = #tpu.pipeline_mode<synchronous>, transform_indices = @transform_4, window_bounds = array<i64: 1, 32>}, {transform_indices = @transform_5, window_bounds = array<i64: 16, 32>}]} {
    %c0 = arith.constant 0 : index
    %c0_0 = arith.constant 0 : index
    %0 = vector.load %arg3[%c0, %c0_0] : memref<16x32xf32, #tpu.memory_space<vmem>>, vector<16x32xf32>
    %cst = arith.constant dense<0.000000e+00> : vector<16xf32>
    %1 = vector.multi_reduction <add>, %0, %cst [1] : vector<16x32xf32> to vector<16xf32>
    %2 = vector.shape_cast %1 : vector<16xf32> to vector<16x1xf32>
    %cst_1 = arith.constant 3.200000e+01 : f32
    %3 = vector.broadcast %cst_1 : f32 to vector<16x1xf32>
    %4 = arith.divf %2, %3 : vector<16x1xf32>
    %5 = vector.broadcast %4 : vector<16x1xf32> to vector<16x32xf32>
    %6 = arith.subf %0, %5 : vector<16x32xf32>
    %7 = arith.mulf %6, %6 : vector<16x32xf32>
    %cst_2 = arith.constant dense<0.000000e+00> : vector<16xf32>
    %8 = vector.multi_reduction <add>, %7, %cst_2 [1] : vector<16x32xf32> to vector<16xf32>
    %9 = vector.shape_cast %8 : vector<16xf32> to vector<16x1xf32>
    %cst_3 = arith.constant 3.100000e+01 : f32
    %10 = vector.broadcast %cst_3 : f32 to vector<16x1xf32>
    %11 = arith.divf %9, %10 : vector<16x1xf32>
    %12 = math.sqrt %11 : vector<16x1xf32>
    %cst_4 = arith.constant 9.99999997E-7 : f32
    %13 = vector.broadcast %cst_4 : f32 to vector<16x1xf32>
    %14 = arith.addf %12, %13 : vector<16x1xf32>
    %15 = tpu.reciprocal %14 {approx = true} : vector<16x1xf32> -> vector<16x1xf32>
    %c0_5 = arith.constant 0 : index
    %16 = memref.load %arg1[%c0_5] : memref<1xf32, #tpu.memory_space<smem>>
    %17 = vector.broadcast %15 : vector<16x1xf32> to vector<16x32xf32>
    %18 = arith.mulf %6, %17 : vector<16x32xf32>
    %19 = vector.broadcast %16 : f32 to vector<16x32xf32>
    %20 = arith.mulf %19, %18 : vector<16x32xf32>
    %c0_6 = arith.constant 0 : index
    %21 = memref.load %arg2[%c0_6] : memref<1xf32, #tpu.memory_space<smem>>
    %22 = vector.broadcast %21 : f32 to vector<16x32xf32>
    %23 = arith.addf %20, %22 : vector<16x32xf32>
    %24 = arith.truncf %23 : vector<16x32xf32> to vector<16x32xbf16>
    %c0_7 = arith.constant 0 : index
    %c0_8 = arith.constant 0 : index
    %25 = vector.load %arg4[%c0_7, %c0_8] : memref<32x32xbf16, #tpu.memory_space<vmem>>, vector<32x32xbf16>
    %cst_9 = arith.constant dense<0.000000e+00> : vector<16x32xf32>
    %26 = tpu.matmul %24, %25, %cst_9 {dimension_numbers = #tpu.dot_dimension_numbers<[1], [0], [0], [1], [0, 0, 1, 1], [], []>} : vector<16x32xbf16>, vector<32x32xbf16>, vector<16x32xf32> -> vector<16x32xf32>
    %c0_10 = arith.constant 0 : index
    %c0_11 = arith.constant 0 : index
    %27 = vector.load %arg5[%c0_10, %c0_11] : memref<1x32xf32, #tpu.memory_space<vmem>>, vector<1x32xf32>
    %28 = vector.broadcast %27 : vector<1x32xf32> to vector<16x32xf32>
    %29 = arith.addf %26, %28 : vector<16x32xf32>
    %c0_12 = arith.constant 0 : index
    %c0_13 = arith.constant 0 : index
    %30 = vector.load %arg3[%c0_12, %c0_13] : memref<16x32xf32, #tpu.memory_space<vmem>>, vector<16x32xf32>
    %31 = arith.addf %30, %29 : vector<16x32xf32>
    %c0_14 = arith.constant 0 : index
    %c0_15 = arith.constant 0 : index
    %32 = vector.load %arg6[%c0_14, %c0_15] : memref<16x32xf32, #tpu.memory_space<vmem>>, vector<16x32xf32>
    tpu.vector_store %arg6[%c0_14, %c0_15], %31 {strides = array<i32>} : memref<16x32xf32, #tpu.memory_space<vmem>>, vector<16x32xf32>,
    return
  }
  func.func @transform_0(%arg0: i32) -> i32 {
    %c0_i32 = arith.constant 0 : i32
    %c0_i32_0 = arith.constant 0 : i32
    return %c0_i32 : i32
  }
  func.func @transform_1(%arg0: i32) -> i32 {
    %c0_i32 = arith.constant 0 : i32
    %c0_i32_0 = arith.constant 0 : i32
    return %c0_i32 : i32
  }
  func.func @transform_2(%arg0: i32) -> (i32, i32) {
    %c0_i32 = arith.constant 0 : i32
    %c0_i32_0 = arith.constant 0 : i32
    return %arg0, %c0_i32 : i32, i32
  }
  func.func @transform_3(%arg0: i32) -> (i32, i32) {
    %c0_i32 = arith.constant 0 : i32
    %c0_i32_0 = arith.constant 0 : i32
    %c0_i32_1 = arith.constant 0 : i32
    return %c0_i32, %c0_i32_0 : i32, i32
  }
  func.func @transform_4(%arg0: i32) -> (i32, i32) {
    %c0_i32 = arith.constant 0 : i32
    %c0_i32_0 = arith.constant 0 : i32
    %c0_i32_1 = arith.constant 0 : i32
    return %c0_i32, %c0_i32_0 : i32, i32
  }
  func.func @transform_5(%arg0: i32) -> (i32, i32) {
    %c0_i32 = arith.constant 0 : i32
    %c0_i32_0 = arith.constant 0 : i32
    return %arg0, %c0_i32 : i32, i32
  }
}

</mosaic_0001>

<bundles_post_ra>
// kernel: tpu_custom_call.1
= control target key start
LH: loop header
LB: loop body
LE: loop exit
PB: predicated region body
PF: predicated region fallthrough
CT: control target
= control target key end

     0   :  { %12 = vsyncpa [#allocation5], 0  ;;  %s408_s0 = inlined_call_operand.<no memory space> [shape: f32[1], index: 0, kind: input, shape index: {}]   ;;  %s409_s1 = inlined_call_operand.<no memory space> [shape: f32[1], index: 1, kind: input, shape index: {}]   ;;  %s410_s2 = inlined_call_operand.hbm [shape: f32[16,32], index: 2, kind: input, shape index: {}]   ;;  %s411_s3 = inlined_call_operand.hbm [shape: bf16[32,32], index: 3, kind: input, shape index: {}]   ;;  %s412_s4 = inlined_call_operand.vmem [shape: f32[1,32], index: 4, kind: input, shape index: {}]   ;;  %s413_s5 = inlined_call_operand.hbm [shape: f32[16,32], index: 5, kind: output, shape index: {}]  }
   0x1   :  { %13 = vsyncpa [#allocation8], 0 }
   0x2   :  { %14 = vsyncpa [#allocation6], 0  ;;  %s301_s18 = smov [#allocation4]   ;;  %s229_s22 = scalar_lea.hbm %s410_s2, 256 }
   0x3   :  { %s24_s19 = sshll.u32 %s301_s18, 4  ;;  %p230_p0 = scmp.ne.s32.totalorder %s410_s2, %s229_s22  ;;  %s25_s19 = int_to_ptr.vmem [resolvable:$true] %s24_s19 }
   0x4   :  { %p233_p1 = scmp.lt.u32.totalorder %s229_s22, %s410_s2 }
   0x6   :  { %p235_p2 = pnand %p233_p1, %p230_p0 }
   0x8   :  { %238 = shalt.err (!%p235_p2)
}
   0x9   :  { %s239_s27 = scalar_lea.vmem %s25_s19, 256  ;;  %p244_p4 = scmp.lt.s32.totalorder %s25_s19, %s25_s19 }
   0xa   :  { %p240_p3 = scmp.ne.s32.totalorder %s25_s19, %s239_s27  ;;  %p245_p5 = scmp.lt.s32.totalorder %s239_s27, %s239_s27 }
   0xc   :  { %p246_p6 = por %p245_p5, %p244_p4 }
   0xe   :  { %p247_p7 = pnand %p246_p6, %p240_p3 }
  0x10   :  { %250 = shalt.err (!%p247_p7)
}
  0x11   :  { %s302_s28 = smov 128   ;;  %s303_s29 = smov 8  }
  0x12   :  { %30 = dma.hbm_to_vmem [thread:$0]  %s410_s2, 256, %s25_s19, [#allocation5], %s302_s28, %s302_s28, %s303_s29  }
  0x13   :  { %s304_s7 = smov [#allocation7]   ;;  %s251_s11 = scalar_lea.hbm %s411_s3, 256 }
  0x14   :  { %s36_s8 = sshll.u32 %s304_s7, 4  ;;  %p252_p8 = scmp.ne.s32.totalorder %s411_s3, %s251_s11  ;;  %s37_s8 = int_to_ptr.vmem [resolvable:$true] %s36_s8 }
  0x15   :  { %p255_p9 = scmp.lt.u32.totalorder %s251_s11, %s411_s3 }
  0x17   :  { %p257_p10 = pnand %p255_p9, %p252_p8 }
  0x19   :  { %260 = shalt.err (!%p257_p10)
}
  0x1a   :  { %s261_s16 = scalar_lea.vmem %s37_s8, 256  ;;  %p266_p12 = scmp.lt.s32.totalorder %s37_s8, %s37_s8 }
  0x1b   :  { %p262_p11 = scmp.ne.s32.totalorder %s37_s8, %s261_s16  ;;  %p267_p13 = scmp.lt.s32.totalorder %s261_s16, %s261_s16 }
  0x1d   :  { %p268_p0 = por %p267_p13, %p266_p12 }
  0x1f   :  { %p269_p1 = pnand %p268_p0, %p262_p11 }
  0x21   :  { %272 = shalt.err (!%p269_p1)
}
  0x22   :  { %s305_s2 = smov 64   ;;  %s306_s17 = smov 4  }
  0x23   :  { %42 = dma.hbm_to_vmem [thread:$0]  %s411_s3, 256, %s37_s8, [#allocation8], %s305_s2, %s305_s2, %s306_s17  }
  0x24   :  { %295 = dma.done.wait [#allocation5], 256  }
  0x25   :  { %296 = vsyncadd [#allocation5], 4294967040 }
  0x26   :  { %297 = dma.done.wait [#allocation8], 256  }
  0x27   :  { %298 = vsyncadd [#allocation8], 4294967040  ;;  %vm54_vm0 = vcmask 261120   ;;  %v367_v0 = vld [vmem:[#allocation4] sm:$0xff]  ;;  %v369_v1 = vld [vmem:[#allocation4 + $0x8] sm:$0xff]  ;;  %v307_v15 = vmov 0.0   ;;  %v98_v35 = vstv %s408_s0  ;;  %v102_v39 = vstv %s409_s1 }
  0x28   :  { %v55_v2 = vsel %vm54_vm0, %v367_v0, 0.0  ;;  %v58_v3 = vsel %vm54_vm0, %v369_v1, 0.0  ;;  %v219_v14 = vld [vmem:[#allocation7] sm:$0xff]   ;;  %202 = vmatprep.subr.bf16.mxu0 %v307_v15  ;;  %vm308_vm1 = vmmov 0   ;;  %v220_v16 = vld [vmem:[#allocation7 + $0x8] sm:$0xff]   ;;  %s309_s0 = smov [#allocation9]  }
  0x29   :  { %56 = vadd.xlane.f32.xlu0 %v55_v2  ;;  %206 = vmatprep.mubr.msk.bf16.mxu0 %vm308_vm1, %v307_v15  ;;  %v195_v44 = vld [vmem:[%s412_s4] ss:$0 sm:$0xff]  ;;  %s182_s25 = sshll.u32 %s309_s0, 4  ;;  %s183_s25 = int_to_ptr.vmem [resolvable:$true] %s182_s25 }
  0x2a   :  { %203 = vmatpush3.bf16.msra.mxu0 %v219_v14  ;;  %s273_s1 = scalar_lea.vmem %s183_s25, 256  ;;  %p278_p3 = scmp.lt.s32.totalorder %s183_s25, %s183_s25 }
  0x2b   :  { %204 = vmatprep.subr.bf16.mxu0 %v307_v15  ;;  %p274_p2 = scmp.ne.s32.totalorder %s183_s25, %s273_s1  ;;  %p279_p4 = scmp.lt.s32.totalorder %s273_s1, %s273_s1 }
  0x2d   :  { %59 = vadd.xlane.f32.xlu0 %v58_v3  ;;  %p280_p5 = por %p279_p4, %p278_p3 }
  0x2e   :  { %205 = vmatpush3.bf16.msra.mxu0 %v220_v16 }
  0x2f   :  { %p281_p6 = pnand %p280_p5, %p274_p2 }
  0xb6   :  { %v57_v4 = vpop.xlane.xlu0 %56 }
  0xb7   :  { %v62_v5 = vmul.f32 0.03125, %v57_v4 }
  0xb9   :  { %v64_v6 = vsub.f32 %v367_v0, %v62_v5 }
  0xba   :  { %v60_v7 = vpop.xlane.xlu0 %59 }
  0xbb   :  { %v63_v8 = vmul.f32 0.03125, %v60_v7  ;;  %v66_v9 = vmul.f32 %v64_v6, %v64_v6 }
  0xbd   :  { %v65_v10 = vsub.f32 %v369_v1, %v63_v8  ;;  %v68_v11 = vsel %vm54_vm0, %v66_v9, 0.0 }
  0xbe   :  { %69 = vadd.xlane.f32.xlu1 %v68_v11 }
  0xbf   :  { %v67_v12 = vmul.f32 %v65_v10, %v65_v10 }
  0xc1   :  { %v71_v13 = vsel %vm54_vm0, %v67_v12, 0.0 }
  0xc2   :  { %72 = vadd.xlane.f32.xlu1 %v71_v13 }
 0x14b   :  { %v70_v17 = vpop.xlane.xlu1 %69 }
 0x14c   :  { %v75_v18 = vmul.f32 0.032258064, %v70_v17 }
 0x14e   :  { %221 = vrsqrt.f32 %v75_v18  ;;  %vm79_vm2 = vcmp.eq.f32.partialorder %v75_v18, inf  ;;  %v82_v23 = vand.u32 2147483648, %v75_v18  ;;  %vm81_vm3 = vcmp.eq.f32.partialorder %v75_v18, 0.0 }
 0x14f   :  { %v73_v19 = vpop.xlane.xlu1 %72 }
 0x150   :  { %v76_v20 = vmul.f32 0.032258064, %v73_v19 }
 0x152   :  { %223 = vrsqrt.f32 %v76_v20  ;;  %vm86_vm4 = vcmp.eq.f32.partialorder %v76_v20, inf  ;;  %v89_v29 = vand.u32 2147483648, %v76_v20  ;;  %vm88_vm5 = vcmp.eq.f32.partialorder %v76_v20, 0.0 }
 0x158   :  { %v222_v21 = vpop.eup %221 }
 0x159   :  { %v78_v22 = vmul.f32 %v222_v21, %v75_v18 }
 0x15b   :  { %v80_v24 = vsel %vm79_vm2, %v75_v18, %v78_v22 }
 0x15c   :  { %v224_v25 = vpop.eup %223  ;;  %v83_v26 = vsel %vm81_vm3, %v82_v23, %v80_v24 }
 0x15d   :  { %v91_v27 = vadd.f32 1e-06, %v83_v26  ;;  %v85_v28 = vmul.f32 %v224_v25, %v76_v20 }
 0x15f   :  { %225 = vrcp.f32 %v91_v27  ;;  %v87_v30 = vsel %vm86_vm4, %v76_v20, %v85_v28 }
 0x160   :  { %v90_v31 = vsel %vm88_vm5, %v89_v29, %v87_v30 }
 0x161   :  { %v92_v32 = vadd.f32 1e-06, %v90_v31 }
 0x163   :  { %227 = vrcp.f32 %v92_v32 }
 0x169   :  { %v226_v33 = vpop.eup %225 }
 0x16a   :  { %v96_v34 = vmul.f32 %v226_v33, %v64_v6 }
 0x16c   :  { %v99_v38 = vmul.f32 %v98_v35, %v96_v34 }
 0x16d   :  { %v228_v36 = vpop.eup %227 }
 0x16e   :  { %v97_v37 = vmul.f32 %v228_v36, %v65_v10  ;;  %v103_v41 = vadd.f32 %v102_v39, %v99_v38 }
 0x170   :  { %v100_v40 = vmul.f32 %v98_v35, %v97_v37 }
 0x172   :  { %v104_v42 = vadd.f32 %v102_v39, %v100_v40 }
 0x174   :  { %v105_v43 = vpack.c.bf16 %v104_v42, %v103_v41 }
 0x176   :  { %207 = vmatmul.mubr.msk.bf16.vlgmr.msra.gmra.mrb[0].mxu0 %vm54_vm0, %v105_v43 }
 0x249   :  { %v166_v45 = vpop.f32.mrb[0].mxu0 }
 0x24a   :  { %v167_v46 = vadd.f32 %v195_v44, %v166_v45  ;;  %v208_v47 = vpop.f32.mrb[1].mxu0 }
 0x24b   :  { %v169_v48 = vpop.f32.mrb[2].mxu0 }
 0x24c   :  { %v173_v49 = vadd.f32 %v167_v46, %v367_v0  ;;  %v170_v50 = vadd.f32 %v195_v44, %v169_v48  ;;  %v209_v51 = vpop.f32.mrb[3].mxu0 }
 0x24e   :  { %175 = vst.msk [vmem:[#allocation9] sm:$0xff] %vm54_vm0, %v173_v49  ;;  %v174_v52 = vadd.f32 %v170_v50, %v369_v1 }
 0x250   :  { %176 = vst.msk [vmem:[#allocation9 + $0x8] sm:$0xff] %vm54_vm0, %v174_v52 }
 0x251   :  { %284 = shalt.err (!%p281_p6)
}
 0x252   :  { %s285_s27 = scalar_lea.hbm %s413_s5, 256 }
 0x253   :  { %p286_p7 = scmp.ne.s32.totalorder %s413_s5, %s285_s27  ;;  %p289_p8 = scmp.lt.u32.totalorder %s285_s27, %s413_s5 }
 0x255   :  { %p291_p9 = pnand %p289_p8, %p286_p7 }
 0x257   :  { %294 = shalt.err (!%p291_p9)
}
 0x258   :  { %188 = dma.vmem_to_hbm [thread:$0]  %s183_s25, 256, %s413_s5, [#allocation6], %s302_s28, %s302_s28, %s303_s29  }
 0x259   :  { %299 = dma.done.wait [#allocation6], 256  }
 0x25a   :  { %300 = vsyncadd [#allocation6], 4294967040 }
 0x25b   :  { %192 = vsyncpa [#allocation5], 1 }
 0x25c   :  { %193 = vsyncpa [#allocation8], 1 }
 0x25d   :  { %194 = vsyncpa [#allocation6], 1 }

</bundles_post_ra>
